<compile_context>
chip_gen: v5e
topology: v5e:2x2
jax: 0.10.0
libtpu: 0.0.40
codegen_flags: <defaults>
</compile_context>

<pallas_src>
import functools

import jax
import jax.numpy as jnp
from jax.experimental import pallas as pl
from jax.experimental.pallas import tpu as pltpu


def _mlp_attention_kernel(q_ref, m_ref, wqT_ref, bq_ref, wmT_ref, v_ref,
                          out_ref, w_ref, mh_ref, attn_ref,
                          *, lm_chunk, mxu_dtype, act_dtype):
    lq_idx = pl.program_id(1)

    # --- memory projection: once per batch element (Lq axis is innermost/"arbitrary") ---
    @pl.when(lq_idx == 0)
    def _():
        mem = m_ref[0].astype(mxu_dtype)                              # (Lm, Dm)
        mh = jnp.dot(mem, wmT_ref[...].astype(mxu_dtype),
                     preferred_element_type=jnp.float32)              # (Lm, H)
        mh_ref[...] = mh.astype(mh_ref.dtype)

    # --- query projection for this Lq tile (pre-transposed weight, no in-kernel .T) ---
    q = q_ref[0].astype(mxu_dtype)                                    # (lq_tile, Dq)
    qh = jnp.dot(q, wqT_ref[...].astype(mxu_dtype),
                 preferred_element_type=jnp.float32) + bq_ref[...]    # (lq_tile, H) f32
    qh = qh.astype(act_dtype)
    v_row = v_ref[...].astype(act_dtype)                              # (1, H)

    # --- attn = v . tanh(qh + mh), chunked over Lm: the 3-D key tensor never lives whole.
    #     Contraction with v is a VPU multiply + lane reduce (f32 accumulation), not an
    #     N=1 MXU matmul.  Chunk starts are static -> cheap static slices.
    lm_total = attn_ref.shape[1]
    for start in range(0, lm_total, lm_chunk):
        mh_c = mh_ref[pl.ds(start, lm_chunk), :].astype(act_dtype)     # (lm_chunk, H)
        key_c = jnp.tanh(qh[:, None, :] + mh_c[None, :, :])            # (lq_tile, lm_chunk, H)
        attn_c = jnp.sum((key_c * v_row).astype(jnp.float32), axis=-1)  # (lq_tile, lm_chunk)
        attn_ref[:, pl.ds(start, lm_chunk)] = attn_c

    # --- numerically stable softmax over Lm ---
    attn = attn_ref[...]
    amax = jnp.max(attn, axis=-1, keepdims=True)
    e = jnp.exp(attn - amax)
    denom = jnp.sum(e, axis=-1, keepdims=True)
    weights = e * pl.reciprocal(denom, approx=True)
    # replicate `weights[isnan(weights)] = 0` from the PyTorch module
    weights = jnp.where(jnp.isnan(weights), jnp.zeros_like(weights), weights)

    # --- weighted_memory = weights @ memory (bf16 operands, f32 accumulation) ---
    out = jnp.dot(weights.astype(mxu_dtype), m_ref[0].astype(mxu_dtype),
                  preferred_element_type=jnp.float32)                  # (lq_tile, Dm)

    out_ref[0] = out.astype(out_ref.dtype)
    w_ref[0] = weights.astype(w_ref.dtype)


def _pick_lm_chunk(lm, max_chunk):
    if lm <= max_chunk:
        return lm
    for c in range(max_chunk, 0, -1):
        if lm % c == 0:
            return c
    return lm


def mlp_attention(query, memory, wq, bq, wm, v, *,
                  mxu_bf16=True, act_bf16=None, lq_tile=None, lm_chunk=None):
    """mode='mlp' attention.
       query: (B, Lq, Dq), memory: (B, Lm, Dm)
       wq: (H, Dq), bq: (H,), wm: (H, Dm), v: (1, H)   (PyTorch nn.Linear layouts)
       returns (weighted_memory (B, Lq, Dm) f32, weights (B, Lq, Lm) f32)."""
    B, Lq, Dq = query.shape
    _, Lm, Dm = memory.shape
    H = wq.shape[0]

    kind = jax.devices()[0].device_kind.lower()
    is_v7 = "v7" in kind
    is_v5 = "v5" in kind
    if act_bf16 is None:
        # v5e has no bf16 VPU/EUP path -> keep the tanh region in f32 there.
        act_bf16 = not is_v5

    mxu_dtype = jnp.bfloat16 if mxu_bf16 else jnp.float32
    act_dtype = jnp.bfloat16 if act_bf16 else jnp.float32

    # Tile sizes: keep (key chunk + attn scratch + double-buffered query/memory/output
    # blocks) comfortably inside scoped VMEM; v7x has only 64 MiB physical VMEM per TC.
    if lq_tile is None:
        lq_tile = Lq if Lq <= 128 else 128          # multiple of 8 or full extent
    if lm_chunk is None:
        lm_chunk = _pick_lm_chunk(Lm, 128 if is_v7 else 256)
    n_lq_tiles = pl.cdiv(Lq, lq_tile)

    # One-time host-side weight re-layout: kernel sees already-transposed operands.
    wqT = jnp.transpose(wq)        # (Dq, H)
    wmT = jnp.transpose(wm)        # (Dm, H)
    bq2 = bq.reshape(1, H)
    v2 = v.reshape(1, H)

    kernel = functools.partial(_mlp_attention_kernel,
                               lm_chunk=lm_chunk,
                               mxu_dtype=mxu_dtype,
                               act_dtype=act_dtype)

    out_shapes = (
        jax.ShapeDtypeStruct((B, Lq, Dm), jnp.float32),   # weighted_memory
        jax.ShapeDtypeStruct((B, Lq, Lm), jnp.float32),   # weights
    )
    # TODO(synk): for workloads that tolerate it, emit the weights output in bf16 to
    # halve HBM writeback (largest HBM term on v5e).

    grid_spec = pltpu.PrefetchScalarGridSpec(
        num_scalar_prefetch=0,
        grid=(B, n_lq_tiles),
        in_specs=[
            pl.BlockSpec((1, lq_tile, Dq), lambda b, q: (b, q, 0)),   # query tile
            pl.BlockSpec((1, Lm, Dm), lambda b, q: (b, 0, 0)),        # memory (per batch)
            pl.BlockSpec((Dq, H), lambda b, q: (0, 0)),               # WqT
            pl.BlockSpec((1, H), lambda b, q: (0, 0)),                # bq
            pl.BlockSpec((Dm, H), lambda b, q: (0, 0)),               # WmT
            pl.BlockSpec((1, H), lambda b, q: (0, 0)),                # v
        ],
        out_specs=[
            pl.BlockSpec((1, lq_tile, Dm), lambda b, q: (b, q, 0)),
            pl.BlockSpec((1, lq_tile, Lm), lambda b, q: (b, q, 0)),
        ],
        scratch_shapes=[
            pltpu.VMEM((Lm, H), act_dtype),          # mh: reused across all Lq tiles of a batch
            pltpu.VMEM((lq_tile, Lm), jnp.float32),  # attn logits of current Lq tile
        ],
    )

    vmem_limit = (48 if is_v7 else 96) * 1024 * 1024

    return pl.pallas_call(
        kernel,
        out_shape=out_shapes,
        grid_spec=grid_spec,
        compiler_params=pltpu.CompilerParams(
            dimension_semantics=("parallel", "arbitrary"),
            vmem_limit_bytes=vmem_limit),
    )(query, memory, wqT, bq2, wmT, v2)


def _reference(query, memory, wq, bq, wm, v):
    qh = jnp.einsum('bqd,hd->bqh', query, wq) + bq
    mh = jnp.einsum('bkd,hd->bkh', memory, wm)
    key = jnp.tanh(qh[:, :, None, :] + mh[:, None, :, :])
    attn = jnp.einsum('bqkh,h->bqk', key, v[0])
    w = jax.nn.softmax(attn, axis=-1)
    w = jnp.where(jnp.isnan(w), 0.0, w)
    out = jnp.einsum('bqk,bkd->bqd', w, memory)
    return out, w


if __name__ == "__main__":
    # Small shapes consistent with the module's forward.
    B, Lq, Lm = 2, 8, 8
    query_size, memory_size, hidden_size = 32, 32, 32

    key = jax.random.PRNGKey(0)
    kq, km, k1, k2, k3, k4 = jax.random.split(key, 6)

    query = jax.random.normal(kq, (B, Lq, query_size), dtype=jnp.float32)
    memory = jax.random.normal(km, (B, Lm, memory_size), dtype=jnp.float32)

    # Deterministic parameter init (shapes as in nn.Linear: weight (out, in)).
    wq = 0.1 * jax.random.normal(k1, (hidden_size, query_size), dtype=jnp.float32)
    bq = 0.1 * jax.random.normal(k2, (hidden_size,), dtype=jnp.float32)
    wm = 0.1 * jax.random.normal(k3, (hidden_size, memory_size), dtype=jnp.float32)
    v = 0.1 * jax.random.normal(k4, (1, hidden_size), dtype=jnp.float32)

    ref_out, ref_w = _reference(query, memory, wq, bq, wm, v)

    # 1) Full-precision path: tight check of the restructured kernel
    #    (only the approx-reciprocal softmax divide differs from the reference).
    out32, w32 = mlp_attention(query, memory, wq, bq, wm, v,
                               mxu_bf16=False, act_bf16=False)
    jax.block_until_ready((out32, w32))
    assert jnp.allclose(w32, ref_w, atol=3e-3, rtol=3e-3), "f32 weights mismatch"
    assert jnp.allclose(out32, ref_out, atol=3e-3, rtol=3e-3), "f32 output mismatch"

    # 2) Default fast path (bf16 MXU operands; bf16 tanh on v6e/v7x): relaxed tolerances.
    out, weights = mlp_attention(query, memory, wq, bq, wm, v)
    jax.block_until_ready((out, weights))
    assert jnp.allclose(weights, ref_w, atol=5e-2, rtol=5e-2), "bf16 weights mismatch"
    assert jnp.allclose(out, ref_out, atol=5e-2, rtol=5e-2), "bf16 output mismatch"

    print("KERNEL_OK")
</pallas_src>

<mosaic_0001>
module attributes {stable_mosaic.version = 11 : i64} {
  func.func @_mlp_attention_kernel(%arg0: i32, %arg1: i32, %arg2: memref<1x8x32xf32, #tpu.memory_space<vmem>>, %arg3: memref<1x8x32xf32, #tpu.memory_space<vmem>>, %arg4: memref<32x32xf32, #tpu.memory_space<vmem>>, %arg5: memref<1x32xf32, #tpu.memory_space<vmem>>, %arg6: memref<32x32xf32, #tpu.memory_space<vmem>>, %arg7: memref<1x32xf32, #tpu.memory_space<vmem>>, %arg8: memref<1x8x32xf32, #tpu.memory_space<vmem>>, %arg9: memref<1x8x8xf32, #tpu.memory_space<vmem>>, %arg10: memref<8x32xf32, #tpu.memory_space<vmem>>, %arg11: memref<8x8xf32, #tpu.memory_space<vmem>>) attributes {dimension_semantics = [#tpu.dimension_semantics<parallel>, #tpu.dimension_semantics<arbitrary>], iteration_bounds = array<i64: 2, 1>, scalar_prefetch = 0 : i64, scratch_operands = 2 : i64, tpu.core_type = #tpu.core_type<tc>, window_params = [{transform_indices = @transform_0, window_bounds = array<i64: 1, 8, 32>}, {transform_indices = @transform_1, window_bounds = array<i64: 1, 8, 32>}, {pipeline_mode = #tpu.pipeline_mode<synchronous>, transform_indices = @transform_2, window_bounds = array<i64: 32, 32>}, {pipeline_mode = #tpu.pipeline_mode<synchronous>, transform_indices = @transform_3, window_bounds = array<i64: 1, 32>}, {pipeline_mode = #tpu.pipeline_mode<synchronous>, transform_indices = @transform_4, window_bounds = array<i64: 32, 32>}, {pipeline_mode = #tpu.pipeline_mode<synchronous>, transform_indices = @transform_5, window_bounds = array<i64: 1, 32>}, {transform_indices = @transform_6, window_bounds = array<i64: 1, 8, 32>}, {transform_indices = @transform_7, window_bounds = array<i64: 1, 8, 8>}]} {
    %c0_i32 = arith.constant 0 : i32
    %0 = arith.cmpi eq, %arg1, %c0_i32 : i32
    %1 = arith.extui %0 : i1 to i32
    %c0_i32_0 = arith.constant 0 : i32
    %2 = arith.cmpi ne, %1, %c0_i32_0 : i32
    scf.if %2 {
      %c0_29 = arith.constant 0 : index
      %c0_30 = arith.constant 0 : index
      %c0_31 = arith.constant 0 : index
      %46 = vector.load %arg3[%c0_29, %c0_30, %c0_31] : memref<1x8x32xf32, #tpu.memory_space<vmem>>, vector<1x8x32xf32>
      %47 = vector.shape_cast %46 : vector<1x8x32xf32> to vector<8x32xf32>
      %c0_32 = arith.constant 0 : index
      %c0_33 = arith.constant 0 : index
      %48 = vector.load %arg6[%c0_32, %c0_33] : memref<32x32xf32, #tpu.memory_space<vmem>>, vector<32x32xf32>
      %cst_34 = arith.constant dense<0.000000e+00> : vector<8x32xf32>
      %49 = tpu.matmul %47, %48, %cst_34 {dimension_numbers = #tpu.dot_dimension_numbers<[1], [0], [0], [1], [0, 0, 1, 1], [], []>} : vector<8x32xf32>, vector<32x32xf32>, vector<8x32xf32> -> vector<8x32xf32>
      %c0_35 = arith.constant 0 : index
      %c0_36 = arith.constant 0 : index
      %50 = vector.load %arg10[%c0_35, %c0_36] : memref<8x32xf32, #tpu.memory_space<vmem>>, vector<8x32xf32>
      tpu.vector_store %arg10[%c0_35, %c0_36], %49 {strides = array<i32>} : memref<8x32xf32, #tpu.memory_space<vmem>>, vector<8x32xf32>,
    } else {
    }
    %c0 = arith.constant 0 : index
    %c0_1 = arith.constant 0 : index
    %c0_2 = arith.constant 0 : index
    %3 = vector.load %arg2[%c0, %c0_1, %c0_2] : memref<1x8x32xf32, #tpu.memory_space<vmem>>, vector<1x8x32xf32>
    %4 = vector.shape_cast %3 : vector<1x8x32xf32> to vector<8x32xf32>
    %c0_3 = arith.constant 0 : index
    %c0_4 = arith.constant 0 : index
    %5 = vector.load %arg4[%c0_3, %c0_4] : memref<32x32xf32, #tpu.memory_space<vmem>>, vector<32x32xf32>
    %cst = arith.constant dense<0.000000e+00> : vector<8x32xf32>
    %6 = tpu.matmul %4, %5, %cst {dimension_numbers = #tpu.dot_dimension_numbers<[1], [0], [0], [1], [0, 0, 1, 1], [], []>} : vector<8x32xf32>, vector<32x32xf32>, vector<8x32xf32> -> vector<8x32xf32>
    %c0_5 = arith.constant 0 : index
    %c0_6 = arith.constant 0 : index
    %7 = vector.load %arg5[%c0_5, %c0_6] : memref<1x32xf32, #tpu.memory_space<vmem>>, vector<1x32xf32>
    %8 = vector.broadcast %7 : vector<1x32xf32> to vector<8x32xf32>
    %9 = arith.addf %6, %8 : vector<8x32xf32>
    %c0_7 = arith.constant 0 : index
    %c0_8 = arith.constant 0 : index
    %10 = vector.load %arg7[%c0_7, %c0_8] : memref<1x32xf32, #tpu.memory_space<vmem>>, vector<1x32xf32>
    %c0_9 = arith.constant 0 : index
    %c0_10 = arith.constant 0 : index
    %11 = vector.load %arg10[%c0_9, %c0_10] : memref<8x32xf32, #tpu.memory_space<vmem>>, vector<8x32xf32>
    %12 = vector.shape_cast %9 : vector<8x32xf32> to vector<8x1x32xf32>
    %13 = vector.shape_cast %11 : vector<8x32xf32> to vector<1x8x32xf32>
    %14 = vector.broadcast %12 : vector<8x1x32xf32> to vector<8x8x32xf32>
    %15 = vector.broadcast %13 : vector<1x8x32xf32> to vector<8x8x32xf32>
    %16 = arith.addf %14, %15 : vector<8x8x32xf32>
    %17 = math.tanh %16 : vector<8x8x32xf32>
    %18 = vector.shape_cast %10 : vector<1x32xf32> to vector<1x1x32xf32>
    %19 = vector.broadcast %18 : vector<1x1x32xf32> to vector<8x8x32xf32>
    %20 = arith.mulf %17, %19 : vector<8x8x32xf32>
    %cst_11 = arith.constant dense<0.000000e+00> : vector<8x8xf32>
    %21 = vector.multi_reduction <add>, %20, %cst_11 [2] : vector<8x8x32xf32> to vector<8x8xf32>
    %c0_12 = arith.constant 0 : index
    %c0_13 = arith.constant 0 : index
    %22 = vector.load %arg11[%c0_12, %c0_13] : memref<8x8xf32, #tpu.memory_space<vmem>>, vector<8x8xf32>
    tpu.vector_store %arg11[%c0_12, %c0_13], %21 {strides = array<i32>} : memref<8x8xf32, #tpu.memory_space<vmem>>, vector<8x8xf32>,
    %c0_14 = arith.constant 0 : index
    %c0_15 = arith.constant 0 : index
    %23 = vector.load %arg11[%c0_14, %c0_15] : memref<8x8xf32, #tpu.memory_space<vmem>>, vector<8x8xf32>
    %cst_16 = arith.constant dense<0xFF800000> : vector<8xf32>
    %24 = vector.multi_reduction <maximumf>, %23, %cst_16 [1] : vector<8x8xf32> to vector<8xf32>
    %25 = vector.shape_cast %24 : vector<8xf32> to vector<8x1xf32>
    %26 = vector.broadcast %25 : vector<8x1xf32> to vector<8x8xf32>
    %27 = arith.subf %23, %26 : vector<8x8xf32>
    %28 = math.exp %27 : vector<8x8xf32>
    %cst_17 = arith.constant dense<0.000000e+00> : vector<8xf32>
    %29 = vector.multi_reduction <add>, %28, %cst_17 [1] : vector<8x8xf32> to vector<8xf32>
    %30 = vector.shape_cast %29 : vector<8xf32> to vector<8x1xf32>
    %31 = tpu.reciprocal %30 {approx = true} : vector<8x1xf32> -> vector<8x1xf32>
    %32 = vector.broadcast %31 : vector<8x1xf32> to vector<8x8xf32>
    %33 = arith.mulf %28, %32 : vector<8x8xf32>
    %34 = arith.cmpf one, %33, %33 : vector<8x8xf32>
    %cst_18 = arith.constant 0.000000e+00 : f32
    %35 = vector.broadcast %cst_18 : f32 to vector<8x8xf32>
    %36 = arith.select %34, %35, %33 : vector<8x8xi1>, vector<8x8xf32>
    %c0_19 = arith.constant 0 : index
    %c0_20 = arith.constant 0 : index
    %c0_21 = arith.constant 0 : index
    %37 = vector.load %arg3[%c0_19, %c0_20, %c0_21] : memref<1x8x32xf32, #tpu.memory_space<vmem>>, vector<1x8x32xf32>
    %38 = vector.shape_cast %37 : vector<1x8x32xf32> to vector<8x32xf32>
    %cst_22 = arith.constant dense<0.000000e+00> : vector<8x32xf32>
    %39 = tpu.matmul %36, %38, %cst_22 {dimension_numbers = #tpu.dot_dimension_numbers<[1], [0], [0], [1], [0, 0, 1, 1], [], []>} : vector<8x8xf32>, vector<8x32xf32>, vector<8x32xf32> -> vector<8x32xf32>
    %c0_23 = arith.constant 0 : index
    %c0_24 = arith.constant 0 : index
    %c0_25 = arith.constant 0 : index
    %40 = vector.load %arg8[%c0_23, %c0_24, %c0_25] : memref<1x8x32xf32, #tpu.memory_space<vmem>>, vector<1x8x32xf32>
    %41 = vector.shape_cast %40 : vector<1x8x32xf32> to vector<8x32xf32>
    %42 = vector.shape_cast %39 : vector<8x32xf32> to vector<1x8x32xf32>
    tpu.vector_store %arg8[%c0_23, %c0_24, %c0_25], %42 {strides = array<i32>} : memref<1x8x32xf32, #tpu.memory_space<vmem>>, vector<1x8x32xf32>,
    %c0_26 = arith.constant 0 : index
    %c0_27 = arith.constant 0 : index
    %c0_28 = arith.constant 0 : index
    %43 = vector.load %arg9[%c0_26, %c0_27, %c0_28] : memref<1x8x8xf32, #tpu.memory_space<vmem>>, vector<1x8x8xf32>
    %44 = vector.shape_cast %43 : vector<1x8x8xf32> to vector<8x8xf32>
    %45 = vector.shape_cast %36 : vector<8x8xf32> to vector<1x8x8xf32>
    tpu.vector_store %arg9[%c0_26, %c0_27, %c0_28], %45 {strides = array<i32>} : memref<1x8x8xf32, #tpu.memory_space<vmem>>, vector<1x8x8xf32>,
    return
  }
  func.func @transform_0(%arg0: i32, %arg1: i32) -> (i32, i32, i32) {
    %c0_i32 = arith.constant 0 : i32
    %c0_i32_0 = arith.constant 0 : i32
    return %arg0, %arg1, %c0_i32 : i32, i32, i32
  }
  func.func @transform_1(%arg0: i32, %arg1: i32) -> (i32, i32, i32) {
    %c0_i32 = arith.constant 0 : i32
    %c0_i32_0 = arith.constant 0 : i32
    %c0_i32_1 = arith.constant 0 : i32
    return %arg0, %c0_i32, %c0_i32_0 : i32, i32, i32
  }
  func.func @transform_2(%arg0: i32, %arg1: i32) -> (i32, i32) {
    %c0_i32 = arith.constant 0 : i32
    %c0_i32_0 = arith.constant 0 : i32
    %c0_i32_1 = arith.constant 0 : i32
    return %c0_i32, %c0_i32_0 : i32, i32
  }
  func.func @transform_3(%arg0: i32, %arg1: i32) -> (i32, i32) {
    %c0_i32 = arith.constant 0 : i32
    %c0_i32_0 = arith.constant 0 : i32
    %c0_i32_1 = arith.constant 0 : i32
    return %c0_i32, %c0_i32_0 : i32, i32
  }
  func.func @transform_4(%arg0: i32, %arg1: i32) -> (i32, i32) {
    %c0_i32 = arith.constant 0 : i32
    %c0_i32_0 = arith.constant 0 : i32
    %c0_i32_1 = arith.constant 0 : i32
    return %c0_i32, %c0_i32_0 : i32, i32
  }
  func.func @transform_5(%arg0: i32, %arg1: i32) -> (i32, i32) {
    %c0_i32 = arith.constant 0 : i32
    %c0_i32_0 = arith.constant 0 : i32
    %c0_i32_1 = arith.constant 0 : i32
    return %c0_i32, %c0_i32_0 : i32, i32
  }
  func.func @transform_6(%arg0: i32, %arg1: i32) -> (i32, i32, i32) {
    %c0_i32 = arith.constant 0 : i32
    %c0_i32_0 = arith.constant 0 : i32
    return %arg0, %arg1, %c0_i32 : i32, i32, i32
  }
  func.func @transform_7(%arg0: i32, %arg1: i32) -> (i32, i32, i32) {
    %c0_i32 = arith.constant 0 : i32
    %c0_i32_0 = arith.constant 0 : i32
    return %arg0, %arg1, %c0_i32 : i32, i32, i32
  }
}

</mosaic_0001>

<bundles_post_ra>
// kernel: tpu_custom_call.1
= control target key start
LH: loop header
LB: loop body
LE: loop exit
PB: predicated region body
PF: predicated region fallthrough
CT: control target
= control target key end

     0   :  { %s1447_s0 = inlined_call_operand.hbm [shape: f32[2,8,32], index: 0, kind: input, shape index: {}]   ;;  %s1448_s1 = inlined_call_operand.hbm [shape: f32[2,8,32], index: 1, kind: input, shape index: {}]   ;;  %s1449_s2 = inlined_call_operand.hbm [shape: f32[32,32], index: 2, kind: input, shape index: {}]   ;;  %s1450_s3 = inlined_call_operand.vmem [shape: f32[1,32], index: 3, kind: input, shape index: {}]   ;;  %s1451_s4 = inlined_call_operand.hbm [shape: f32[32,32], index: 4, kind: input, shape index: {}]   ;;  %s1452_s5 = inlined_call_operand.vmem [shape: f32[1,32], index: 5, kind: input, shape index: {}]   ;;  %s1453_s6 = inlined_call_operand.hbm [shape: f32[2,8,32], index: 6, kind: output, shape index: {0}]   ;;  %s1454_s7 = inlined_call_operand.hbm [shape: f32[2,8,8], index: 7, kind: output, shape index: {1}]  }
   0x1   :  { %1460 = sst [smem:[#allocation27_spill]] %s1449_s2 }
   0x2   :  { %1461 = sst [smem:[#allocation28_spill]] %s1451_s4 }
   0x3   :  { %13 = vsyncpa [#allocation5], 0 }
   0x4   :  { %15 = vsyncpa [#allocation5 + $0x1], 0 }
   0x5   :  { %16 = vsyncpa [#allocation8], 0 }
   0x6   :  { %18 = vsyncpa [#allocation8 + $0x1], 0 }
   0x7   :  { %19 = vsyncpa [#allocation11], 0 }
   0x8   :  { %20 = vsyncpa [#allocation6], 0 }
   0x9   :  { %22 = vsyncpa [#allocation6 + $0x1], 0 }
   0xa   :  { %23 = vsyncpa [#allocation14], 0 }
   0xb   :  { %25 = vsyncpa [#allocation14 + $0x1], 0  ;;  %s1245_s24 = smov 0   ;;  %s1247_s25 = smov 0  }
   0xc   :  { %s1249_s26 = smov 0   ;;  %s1251_s27 = smov 0  }
   0xd   :  { %s1253_s28 = smov 0   ;;  %s1255_s29 = smov 0  }
   0xe LB: > { %1462 = sst [smem:[#allocation21_spill]] %s1179_s24  ;;  %s1276_s30 = sadd.s32 4294967295, %s1199_s29   ;;  %s1199_s29 = sphi %s1255_s29, %s31_s29   ;;  %s1195_s28 = sphi %s1253_s28, %s1480_s28   ;;  %s1191_s27 = sphi %s1251_s27, %s1479_s27   ;;  %s1187_s26 = sphi %s1249_s26, %s1478_s26   ;;  %s1183_s25 = sphi %s1247_s25, %s1482_s25   ;;  %s1179_s24 = sphi %s1245_s24, %s1481_s24  }
   0xf   : > { %1463 = sst [smem:[#allocation22_spill]] %s1187_s26  ;;  %p812_p0 = scmp.ge.s32.totalorder %s1199_s29, 1 }
  0x10   : > { %1464 = sst [smem:[#allocation23_spill]] %s1195_s28  ;;  %p66_p1 = scmp.eq.s32.totalorder %s1276_s30, 0 }
  0x11   : > { %p242_p2 = scmp.lt.s32.totalorder %s1199_s29, 3  ;;  %s1465_s2 = sld [smem:[#allocation27_spill]] }
  0x12   : > { %s1201_s12 = smov [#allocation9]   ;;  %p815_p6 = scmp.ge.s32.totalorder %s1199_s29, 2 }
  0x13   : > { %p1284_p3 = pnand %p812_p0, %p242_p2  ;;  %s255_s13 = sshll.u32 %s1201_s12, 4  ;;  %s256_s13 = int_to_ptr.vmem [resolvable:$true] %s255_s13 }
  0x14   : > { %s1467_s4 = sld [smem:[#allocation28_spill]]  ;;  %s1202_s17 = smov 128  }
  0x15   : > { %p852_p4 = pneg %p1284_p3  ;;  %s1203_s18 = smov 8  }
  0x16   : > { %s1204_s19 = smov [#allocation10]   ;;  %s811_s21 = sadd.s32 4294967294, %s1199_s29  }
  0x17   : > { %s253_s10 = sshll.u32 %s1465_s2, 4  ;;  %p853_p5 = pnand %p852_p4, %p66_p1  ;;  %s254_s10 = int_to_ptr.hbm [resolvable:$true] %s253_s10 }
  0x18   : > { %s272_s20 = sshll.u32 %s1204_s19, 4  ;;  %s43_s22 = sadd.s32 1, %s1195_s28  ;;  %s273_s20 = int_to_ptr.vmem [resolvable:$true] %s272_s20 }
  0x19   : > { %855 = dma.hbm_to_vmem [thread:$0]  (!%p853_p5), %s254_s10, 512, %s256_s13, [#allocation8], %s1202_s17, %s1202_s17, %s1203_s18  }
  0x1a   : > { %s270_s16 = sshll.u32 %s1467_s4, 4  ;;  %p45_p7 = scmp.ge.s32.totalorder %s43_s22, 2  ;;  %s271_s16 = int_to_ptr.hbm [resolvable:$true] %s270_s16 }
  0x1b   : > { %858 = dma.hbm_to_vmem [thread:$0]  (!%p853_p5), %s271_s16, 512, %s273_s20, [#allocation11], %s1202_s17, %s1202_s17, %s1203_s18  }
  0x1c   : > { %s52_s23 = sadd.s32 1, %s1187_s26  ;;  %p59_p8 = scmp.ne.s32.totalorder %s1187_s26, %s1183_s25 }
  0x1d   : > { %p60_p9 = scmp.eq.s32.totalorder %s1199_s29, 0  ;;  %s1484_s22 = smov (%p45_p7, %s43_s22), 0 }
  0x1e   : > { %1468 = sst [smem:[#allocation24_spill]] %s1484_s22  ;;  %p65_p11 = scmp.ne.s32.totalorder %s1183_s25, %s1179_s24 }
  0x1f   : > { %p1304_p10 = por %p60_p9, %p59_p8  ;;  %s47_s9 = ssub.s32 %s1195_s28, %s1484_s22 }
  0x20   : > { %p201_p12 = scmp.eq.s32.totalorder %s1276_s30, 1  ;;  %p50_p13 = scmp.eq.s32.totalorder %s47_s9, 0 }
  0x21   : > { %p1315_p0 = por %p66_p1, %p65_p11  ;;  %p207_p4 = scmp.eq.s32.totalorder %s811_s21, 1 }
  0x22   : > { %p1319_p2 = por %p201_p12, %p59_p8  ;;  %p875_p7 = scmp.lt.s32.totalorder %s1199_s29, 2 }
  0x23   : > { %s1324_s13 = scalar_select %p50_p13, %s1187_s26, %s52_s23  }
  0x24   : > { %p1326_p5 = por %p207_p4, %p65_p11  ;;  %s289_s15 = sand.u32 1, %s1187_s26  }
  0x25   : > { %1472 = sst [smem:[#allocation25_spill]] %s1324_s13  ;;  %s817_s16 = sshll.u32 %s1195_s28, 3 }
  0x26   : > { %s1473_s14 = scalar_select %p1326_p5, 1, 0 }
  0x27   : > { %s816_s17 = sshll.u32 %s289_s15, 3  ;;  %s298_s20 = scalar_lea.hbm %s1447_s0, %s817_s16 }
  0x28   : > { %1474 = sst [smem:[#allocation26_spill]] %s1473_s14  ;;  %s300_s9 = sshll.u32 %s298_s20, 4  ;;  %s301_s9 = int_to_ptr.hbm [resolvable:$true] %s300_s9 }
  0x29   : > { %s293_s2 = scalar_lea.vmem [#allocation4], %s816_s17  ;;  %p860_p8 = pnand %p875_p7, %p1304_p10 }
  0x2a   : > { %s302_s4 = sshll.u32 %s293_s2, 4  ;;  %s317_s22 = scalar_lea.hbm %s1448_s1, %s817_s16  ;;  %s303_s4 = int_to_ptr.vmem [resolvable:$true] %s302_s4 }
  0x2b   : > { %s309_s13 = sand.u32 1, %s1199_s29   ;;  %s290_s14 = scalar_lea.sflag [#allocation5], %s289_s15 }
  0x2c   : > { %862 = dma.hbm_to_vmem [thread:$0]  (!%p860_p8), %s301_s9, 128, %s303_s4, %s290_s14  }
  0x2d   : > { %s319_s28 = sshll.u32 %s317_s22, 4  ;;  %s313_s26 = scalar_lea.vmem [#allocation7], %s816_s17  ;;  %s320_s28 = int_to_ptr.hbm [resolvable:$true] %s319_s28 }
  0x2e   : > { %s321_s24 = sshll.u32 %s313_s26, 4  ;;  %s310_s18 = scalar_lea.sflag [#allocation8], %s309_s13  ;;  %s322_s24 = int_to_ptr.vmem [resolvable:$true] %s321_s24 }
  0x2f   : > { %865 = dma.hbm_to_vmem [thread:$0]  (!%p860_p8), %s320_s28, 128, %s322_s24, %s310_s18  }
  0x30   : > { %330 = sbr.rel (%p1284_p3) target bundleno = 752 (0x2f0), region = 44  ;;  %s1345_s2 = sand.u32 (!%p1284_p3), 1, %s1183_s25  }
  0x31   : > { %s1348_s8 = sshll.u32 (!%p1284_p3), %s1345_s2, 3  ;;  %s333_s4 = scalar_lea.sflag (!%p1284_p3), [#allocation5], %s1345_s2 }
  0x32   : > { %s336_s22 = scalar_lea.vmem (!%p1284_p3), [#allocation4], %s1348_s8 }
  0x35   : > { %1154 = dma.done.wait (%p1315_p0), %s333_s4, 128  }
  0x36   : > { %1156 = vsyncadd (%p1315_p0), %s333_s4, 4294967168  ;;  %s342_s24 = sand.u32 1, %s1276_s30   ;;  %s346_s28 = scalar_lea.vmem [#allocation7], %s1348_s8 }
  0x37   : > { %s343_s26 = scalar_lea.sflag [#allocation8], %s342_s24 }
  0x38   : > { %1158 = dma.done.wait (%p1315_p0), %s343_s26, 128  }
  0x39   : > { %1160 = vsyncadd (%p1315_p0), %s343_s26, 4294967168 }
  0x3a   : > { %1162 = dma.done.wait (%p66_p1), [#allocation8], 512  }
  0x3b   : > { %1164 = vsyncadd (%p66_p1), [#allocation8], 4294966784 }
  0x3c   : > { %1166 = dma.done.wait (%p66_p1), [#allocation11], 512  }
  0x3d   : > { %1168 = vsyncadd (%p66_p1), [#allocation11], 4294966784  ;;  %v406_v0 = vld [vmem:[#allocation10 + $0x18] sm:$0xff]  ;;  %v405_v1 = vld [vmem:[#allocation10 + $0x10] sm:$0xff]  ;;  %vm407_vm0 = vcmask 261120   ;;  %vm560_vm1 = vcmask 1041409  }
  0x3e   : > { %v436_v2 = vld [vmem:[#allocation9 + $0x18] sm:$0xff]  ;;  %423 = vmatpush.msra.mxu0 %v406_v0  ;;  %v435_v3 = vld [vmem:[#allocation9 + $0x10] sm:$0xff]  ;;  %v404_v4 = vld [vmem:[#allocation10 + $0x8] sm:$0xff]  ;;  %vm562_vm2 = vcmask 1042434   ;;  %vm564_vm3 = vcmask 1043459   ;;  %vm566_vm4 = vcmask 1044484  }
  0x3f   : > { %457 = vmatpush.msra.mxu1 %v436_v2  ;;  %v434_v5 = vld [vmem:[#allocation9 + $0x8] sm:$0xff]  ;;  %v402_v6 = vld [vmem:[%s346_s28] sm:$0xff]  ;;  %v403_v7 = vld [vmem:[#allocation10] sm:$0xff]  ;;  %vm568_vm5 = vcmask 1045509   ;;  %vm570_vm6 = vcmask 1046534   ;;  %vm572_vm7 = vcmask 1047559  }
  0x40   : > { %424 = vmatpush.msra.mxu0 %v405_v1  ;;  %v433_v8 = vld [vmem:[#allocation9] sm:$0xff]  ;;  %610 = vmatpush.msra.mxu2 %v402_v6  ;;  %v931_v10 = vld [vmem:[%s1450_s3] ss:$0 sm:$0xff]  ;;  %v550_v1 = vlaneseq  ;;  %vm575_vm8 = vcmask 64512   ;;  %s397_s14 = scalar_lea.vmem [#allocation13], %s1348_s8  ;;  %s832_s15 = sshll.u32 %s1191_s27, 3 }
  0x41   : > { %458 = vmatpush.msra.mxu1 %v435_v3  ;;  %v432_v9 = vld [vmem:[%s336_s22] sm:$0xff]  ;;  %v932_v34 = vld [vmem:[%s1452_s5] ss:$0 sm:$0xff]  ;;  %s649_s19 = scalar_lea.hbm %s1454_s7, %s832_s15  ;;  %s651_s20 = sshll.u32 %s397_s14, 4  ;;  %s652_s20 = int_to_ptr.vmem [resolvable:$true] %s651_s20 }
  0x42   : > { %425 = vmatpush.msra.mxu0 %v404_v4  ;;  %v551_v3 = vand.u32 127, %v550_v1  ;;  %s653_s9 = sshll.u32 %s649_s19, 4  ;;  %s623_s21 = scalar_lea.sflag [#allocation14], %s1345_s2  ;;  %s654_s9 = int_to_ptr.hbm [resolvable:$true] %s653_s9 }
  0x43   : > { %459 = vmatpush.msra.mxu1 %v434_v5  ;;  %s1087_s23 = sshra.s32 %s654_s9, 4  ;;  %s1093_s27 = scalar_lea.hbm %s1454_s7, 16  ;;  %s1088_s23 = int_to_ptr.hbm [resolvable:$true] %s1087_s23 }
  0x44   : > { %426 = vmatpush.msra.mxu0 %v403_v7  ;;  %s1089_s18 = scalar_lea.hbm %s1088_s23, 8  ;;  %p1094_p10 = scmp.lt.s32.totalorder %s1088_s23, %s1454_s7 }
  0x45   : > { %460 = vmatpush.msra.mxu1 %v433_v8  ;;  %827 = vmatmul.msk.f32.vlgmr.msra.gmra.mxu0 %vm407_vm0, %v402_v6  ;;  %p1090_p1 = scmp.ne.s32.totalorder %s1088_s23, %s1089_s18  ;;  %p1095_p11 = scmp.lt.s32.totalorder %s1093_s27, %s1089_s18 }
  0x46   : > { %828 = vmatmul.msk.f32.vlgmr.msra.gmra.mxu1 %vm407_vm0, %v432_v9 }
  0x47   : > { %p1091_p3 = pnand %p1090_p1, %p1319_p2  ;;  %p1096_p12 = por %p1095_p11, %p1094_p10 }
  0x49   : > { %p1092_p9 = pneg %p1091_p3 }
  0x4b   : > { %p1097_p13 = pnand %p1096_p12, %p1092_p9 }
  0xc2   : > { %v428_v11 = vpop.f32.mrf.mxu0 }
  0xc3   : > { %v462_v12 = vpop.f32.mrf.mxu1  ;;  %431 = vst.msk [vmem:[#allocation2] sm:$0xff] %vm407_vm0, %v428_v11 }
  0xc4   : > { %v463_v13 = vadd.f32 %v931_v10, %v462_v12 }
  0xc6   : > { %v471_v14 = vrot.slane %v463_v13, 4  ;;  %v469_v15 = vrot.slane %v463_v13, 2  ;;  %v472_v16 = vrot.slane %v463_v13, 5  ;;  %v470_v17 = vrot.slane %v463_v13, 3 }
  0xc7   : > { %v475_v20 = vperm.slane %v463_v13, 0  ;;  %v468_v21 = vrot.slane %v463_v13, 1  ;;  %v474_v31 = vrot.slane %v463_v13, 7  ;;  %v473_v33 = vrot.slane %v463_v13, 6 }
  0xc8   : > { %v479_v18 = vperm.slane %v471_v14, 0  ;;  %v477_v19 = vperm.slane %v469_v15, 0  ;;  %v480_v22 = vperm.slane %v472_v16, 0  ;;  %v478_v24 = vperm.slane %v470_v17, 0 }
  0xc9   : > { %v476_v28 = vperm.slane %v468_v21, 0  ;;  %v482_v35 = vperm.slane %v474_v31, 0  ;;  %v481_v37 = vperm.slane %v473_v33, 0 }
  0xca   : > { %v466_v23 = vld [vmem:[#allocation2] sm:$0xff] }
  0xcb   : > { %v495_v25 = vadd.f32 %v479_v18, %v466_v23  ;;  %v493_v26 = vadd.f32 %v477_v19, %v466_v23  ;;  %v491_v27 = vadd.f32 %v475_v20, %v466_v23  ;;  %v496_v29 = vadd.f32 %v480_v22, %v466_v23 }
  0xcc   : > { %v494_v30 = vadd.f32 %v478_v24, %v466_v23  ;;  %v492_v32 = vadd.f32 %v476_v28, %v466_v23  ;;  %v498_v44 = vadd.f32 %v482_v35, %v466_v23  ;;  %v497_v47 = vadd.f32 %v481_v37, %v466_v23 }
  0xcd   : > { %933 = vtanh.f32 %v495_v25 }
  0xce   : > { %935 = vtanh.f32 %v493_v26 }
  0xcf   : > { %937 = vtanh.f32 %v491_v27 }
  0xd0   : > { %939 = vtanh.f32 %v496_v29 }
  0xd1   : > { %941 = vtanh.f32 %v494_v30 }
  0xd2   : > { %943 = vtanh.f32 %v492_v32 }
  0xd3   : > { %v934_v36 = vpop.eup %933  ;;  %945 = vtanh.f32 %v498_v44 }
  0xd4   : > { %v936_v38 = vpop.eup %935  ;;  %v514_v39 = vmul.f32 %v934_v36, %v932_v34  ;;  %947 = vtanh.f32 %v497_v47 }
  0xd5   : > { %v938_v40 = vpop.eup %937  ;;  %v512_v41 = vmul.f32 %v936_v38, %v932_v34 }
  0xd6   : > { %v530_v42 = vsel %vm407_vm0, %v514_v39, 0.0  ;;  %v510_v43 = vmul.f32 %v938_v40, %v932_v34  ;;  %v940_v45 = vpop.eup %939 }
  0xd7   : > { %531 = vadd.xlane.f32.xlu2 %v530_v42  ;;  %v524_v46 = vsel %vm407_vm0, %v512_v41, 0.0  ;;  %v942_v48 = vpop.eup %941  ;;  %v515_v51 = vmul.f32 %v940_v45, %v932_v34 }
  0xd8   : > { %525 = vadd.xlane.f32.xlu1 %v524_v46  ;;  %v518_v49 = vsel %vm407_vm0, %v510_v43, 0.0  ;;  %v944_v50 = vpop.eup %943  ;;  %v513_v52 = vmul.f32 %v942_v48, %v932_v34 }
  0xd9   : > { %519 = vadd.xlane.f32.xlu0 %v518_v49  ;;  %v511_v53 = vmul.f32 %v944_v50, %v932_v34  ;;  %v533_v54 = vsel %vm407_vm0, %v515_v51, 0.0  ;;  %v946_v56 = vpop.eup %945 }
  0xda   : > { %v527_v55 = vsel %vm407_vm0, %v513_v52, 0.0  ;;  %v948_v58 = vpop.eup %947  ;;  %v517_v59 = vmul.f32 %v946_v56, %v932_v34 }
  0xdb   : > { %v521_v57 = vsel %vm407_vm0, %v511_v53, 0.0  ;;  %v516_v60 = vmul.f32 %v948_v58, %v932_v34 }
  0xdc   : > { %v539_v61 = vsel %vm407_vm0, %v517_v59, 0.0 }
  0xdd   : > { %v536_v62 = vsel %vm407_vm0, %v516_v60, 0.0 }
  0xdf   : > { %534 = vadd.xlane.f32.xlu2 %v533_v54 }
  0xe0   : > { %528 = vadd.xlane.f32.xlu1 %v527_v55 }
  0xe1   : > { %522 = vadd.xlane.f32.xlu0 %v521_v57 }
  0xe8   : > { %540 = vadd.xlane.f32.xlu1 %v539_v61 }
  0xe9   : > { %537 = vadd.xlane.f32.xlu0 %v536_v62 }
 0x14a   : > { %v532_v2 = vpop.xlane.xlu2 %531 }
 0x14b   : > { %v526_v63 = vpop.xlane.xlu1 %525  ;;  %v556_v12 = vperm.slane %v532_v2, %v551_v3 }
 0x14c   : > { %v520_v0 = vpop.xlane.xlu0 %519  ;;  %v554_v8 = vperm.slane %v526_v63, %v551_v3 }
 0x14d   : > { %v552_v6 = vperm.slane %v520_v0, %v551_v3 }
 0x152   : > { %v535_v13 = vpop.xlane.xlu2 %534 }
 0x153   : > { %v529_v4 = vpop.xlane.xlu1 %528  ;;  %v557_v17 = vperm.slane %v535_v13, %v551_v3 }
 0x154   : > { %v523_v5 = vpop.xlane.xlu0 %522  ;;  %v555_v9 = vperm.slane %v529_v4, %v551_v3 }
 0x155   : > { %v553_v7 = vperm.slane %v523_v5, %v551_v3 }
 0x157   : > { %v561_v10 = vsel %vm560_vm1, %v553_v7, %v552_v6 }
 0x158   : > { %v563_v11 = vsel %vm562_vm2, %v554_v8, %v561_v10 }
 0x159   : > { %v565_v14 = vsel %vm564_vm3, %v555_v9, %v563_v11 }
 0x15a   : > { %v567_v16 = vsel %vm566_vm4, %v556_v12, %v565_v14 }
 0x15b   : > { %v541_v15 = vpop.xlane.xlu1 %540  ;;  %v569_v21 = vsel %vm568_vm5, %v557_v17, %v567_v16 }
 0x15c   : > { %v559_v18 = vperm.slane %v541_v15, %v551_v3  ;;  %v538_v19 = vpop.xlane.xlu0 %537 }
 0x15d   : > { %v558_v20 = vperm.slane %v538_v19, %v551_v3 }
 0x15f   : > { %v571_v22 = vsel %vm570_vm6, %v558_v20, %v569_v21 }
 0x160   : > { %v573_v23 = vsel %vm572_vm7, %v559_v18, %v571_v22 }
 0x161   : > { %576 = vst.msk [vmem:[#allocation3] sm:$0xff] %vm575_vm8, %v573_v23 }
 0x168   : > { %v577_v24 = vld [vmem:[#allocation3] sm:$0xff] }
 0x169   : > { %v578_v25 = vsel %vm575_vm8, %v577_v24, -inf }
 0x16a   : > { %579 = vmax.xlane.f32.xlu2 %v578_v25 }
 0x1dd   : > { %v580_v26 = vpop.xlane.xlu2 %579 }
 0x1de   : > { %v581_v27 = vsub.f32 %v577_v24, %v580_v26 }
 0x1e0   : > { %v582_v28 = vmul.f32 1.442695, %v581_v27 }
 0x1e2   : > { %949 = vpow2.f32 %v582_v28 }
 0x1e8   : > { %v950_v29 = vpop.eup %949 }
 0x1e9   : > { %v584_v30 = vsel %vm575_vm8, %v950_v29, 0.0 }
 0x1ea   : > { %585 = vadd.xlane.f32.xlu0 %v584_v30 }
 0x25d   : > { %v586_v31 = vpop.xlane.xlu0 %585 }
 0x25e   : > { %951 = vrcp.f32 %v586_v31 }
 0x264   : > { %v952_v32 = vpop.eup %951 }
 0x265   : > { %v588_v33 = vmul.f32 %v952_v32, %v950_v29 }
 0x267   : > { %vm589_vm9 = vcmp.ne.f32.partialorder %v588_v33, %v588_v33 }
 0x268   : > { %v590_v34 = vsel %vm589_vm9, 0.0, %v588_v33 }
 0x269   : > { %829 = vmatmul.msk.f32.vlgmr.msra.gmra.mxu2 %vm575_vm8, %v590_v34  ;;  %616 = vst.msk [vmem:[%s397_s14] sm:$0xff] %vm575_vm8, %v590_v34 }
 0x26a   : > { %1100 = shalt.err (!%p1097_p13)
}
 0x26b   : > { %849 = dma.vmem_to_hbm [thread:$0]  (%p1319_p2), %s652_s20, 128, %s654_s9, %s623_s21  }
 0x26c   : > { %s634_s11 = scalar_lea.hbm %s1453_s6, %s832_s15  ;;  %s390_s10 = scalar_lea.vmem [#allocation12], %s1348_s8 }
 0x26d   : > { %s636_s13 = sshll.u32 %s390_s10, 4  ;;  %s638_s14 = sshll.u32 %s634_s11, 4  ;;  %s637_s13 = int_to_ptr.vmem [resolvable:$true] %s636_s13  ;;  %s639_s14 = int_to_ptr.hbm [resolvable:$true] %s638_s14 }
 0x26e   : > { %s618_s16 = scalar_lea.sflag [#allocation6], %s1345_s2  ;;  %s1115_s17 = sshra.s32 %s639_s14, 4  ;;  %s1116_s17 = int_to_ptr.hbm [resolvable:$true] %s1115_s17 }
 0x26f   : > { %s1117_s19 = scalar_lea.hbm %s1116_s17, 8  ;;  %s1121_s15 = scalar_lea.hbm %s1453_s6, 16 }
 0x270   : > { %p1118_p0 = scmp.ne.s32.totalorder %s1116_s17, %s1117_s19  ;;  %p1122_p8 = scmp.lt.s32.totalorder %s1116_s17, %s1453_s6 }
 0x271   : > { %p1123_p1 = scmp.lt.s32.totalorder %s1121_s15, %s1117_s19 }
 0x272   : > { %p1119_p4 = pnand %p1118_p0, %p1319_p2 }
 0x273   : > { %p1124_p3 = por %p1123_p1, %p1122_p8 }
 0x274   : > { %p1120_p7 = pneg %p1119_p4 }
 0x276   : > { %p1125_p9 = pnand %p1124_p3, %p1120_p7 }
 0x2ec   : > { %v612_v35 = vpop.f32.mrf.mxu2 }
 0x2ed   : > { %615 = vst.msk [vmem:[%s390_s10] sm:$0xff] %vm407_vm0, %v612_v35 }
 0x2ee   : > { %1128 = shalt.err (!%p1125_p9)
}
 0x2ef   : > { %848 = dma.vmem_to_hbm [thread:$0]  (%p1319_p2), %s637_s13, 128, %s639_s14, %s618_s16  }
 0x2f0 PF: > { %s1475_s2 = sld [smem:[#allocation21_spill]]  ;;  %p867_p10 = pnand %p815_p6, %p1326_p5 }
 0x2f2   : > { %p868_p11 = pneg %p867_p10 }
 0x2f6   : > { %s665_s18 = sand.u32 1, %s1475_s2  }
 0x2f7   : > { %s666_s4 = scalar_lea.sflag [#allocation6], %s665_s18 }
 0x2f8   : > { %1170 = dma.done.wait (%p868_p11), %s666_s4, 128  }
 0x2f9   : > { %1172 = vsyncadd (%p868_p11), %s666_s4, 4294967168  ;;  %s676_s22 = scalar_lea.sflag [#allocation14], %s665_s18 }
 0x2fa   : > { %1174 = dma.done.wait (%p868_p11), %s676_s22, 128  }
 0x2fb   : > { %1176 = vsyncadd (%p868_p11), %s676_s22, 4294967168  ;;  %s31_s29 = sadd.s32 1, %s1199_s29   ;;  %s1477_s12 = sld [smem:[#allocation22_spill]] }
 0x2fc   : > { %p28_p12 = scmp.ge.s32.totalorder %s31_s29, 4   ;;  %s1478_s26 = sld [smem:[#allocation25_spill]] }
 0x2fd   : > { %s1479_s27 = sld [smem:[#allocation23_spill]]  ;;  %s1481_s24 = smov %s1183_s25 }
 0x2fe   : > { %s1480_s28 = sld [smem:[#allocation24_spill]]  ;;  %30 = sbr.rel (!%p28_p12) target bundleno = 14 (0xe), region = 131 }
 0x301   : > { %s1482_s25 = smov %s1477_s12 }
 0x303   :  { %682 = vsyncpa [#allocation5], 1 }
 0x304   :  { %684 = vsyncpa [#allocation5 + $0x1], 1 }
 0x305   :  { %685 = vsyncpa [#allocation8], 1 }
 0x306   :  { %687 = vsyncpa [#allocation8 + $0x1], 1 }
 0x307   :  { %688 = vsyncpa [#allocation11], 1 }
 0x308   :  { %689 = vsyncpa [#allocation6], 1 }
 0x309   :  { %691 = vsyncpa [#allocation6 + $0x1], 1 }
 0x30a   :  { %692 = vsyncpa [#allocation14], 1 }
 0x30b   :  { %694 = vsyncpa [#allocation14 + $0x1], 1 }

</bundles_post_ra>
